<compile_context>
chip_gen: v7x
topology: tpu7x:2x2x1
jax: 0.10.0
libtpu: 0.0.40
codegen_flags: <defaults>
</compile_context>

<pallas_src>
import math
import jax
import jax.numpy as jnp
from jax.experimental import pallas as pl
from jax.experimental.pallas import tpu as pltpu


def _round_up(n, m):
    return ((n + m - 1) // m) * m


def _pad2(a, rows, cols):
    pr = rows - a.shape[0]
    pc = cols - a.shape[1]
    if pr or pc:
        a = jnp.pad(a, ((0, pr), (0, pc)))
    return a


def ae_kernel(x_ref,
              w1_ref, b1_ref,   # Linear(D -> H)
              w2_ref, b2_ref,   # Linear(H -> Q)
              w3_ref, b3_ref,   # Linear(Q -> H)
              w4_ref, b4_ref,   # Linear(H -> D)
              enc_ref, dec_ref):
    x = x_ref[...]
    cdt = w1_ref.dtype  # operand dtype for the MXU (f32 or bf16)

    # encoder: Linear -> ReLU -> Linear
    h1 = jnp.dot(x, w1_ref[...], preferred_element_type=jnp.float32) + b1_ref[...]
    h1 = jnp.maximum(h1, 0.0)
    enc = jnp.dot(h1.astype(cdt), w2_ref[...],
                  preferred_element_type=jnp.float32) + b2_ref[...]
    enc_ref[...] = enc.astype(enc_ref.dtype)

    # decoder: ReLU -> Linear -> ReLU -> Linear
    h2 = jnp.maximum(enc, 0.0)
    h3 = jnp.dot(h2.astype(cdt), w3_ref[...],
                 preferred_element_type=jnp.float32) + b3_ref[...]
    h3 = jnp.maximum(h3, 0.0)
    dec = jnp.dot(h3.astype(cdt), w4_ref[...],
                  preferred_element_type=jnp.float32) + b4_ref[...]
    dec_ref[...] = dec.astype(dec_ref.dtype)


def ae_forward(x, params, *, compute_dtype=jnp.float32):
    """x: [B, D] float32.  params: pre-transposed weights (in,out) / biases (1,out).

    Returns (encode [B, Q], decode [B, D]) in float32 (matching the PyTorch AE).
    compute_dtype=jnp.bfloat16 is recommended on v6e/v7x; keep f32 on v5e.
    """
    B, D = x.shape
    H = params["w1"].shape[1]
    Q = params["w2"].shape[1]

    # Lane-pad all feature dims to 128 multiples; sublane-pad the batch to 8.
    Dp = _round_up(D, 128)
    Hp = _round_up(H, 128)
    Qp = _round_up(Q, 128)
    Bp = _round_up(B, 8)
    if Bp <= 512:
        block_b = Bp            # single grid step: no per-step pipeline overhead
    else:
        block_b = 256           # MXU-shaped row tiles for big batches
        Bp = _round_up(B, block_b)

    xp = _pad2(x, Bp, Dp).astype(compute_dtype)
    w1 = _pad2(params["w1"], Dp, Hp).astype(compute_dtype)
    b1 = _pad2(params["b1"], 1, Hp).astype(compute_dtype)
    w2 = _pad2(params["w2"], Hp, Qp).astype(compute_dtype)
    b2 = _pad2(params["b2"], 1, Qp).astype(compute_dtype)
    w3 = _pad2(params["w3"], Qp, Hp).astype(compute_dtype)
    b3 = _pad2(params["b3"], 1, Hp).astype(compute_dtype)
    w4 = _pad2(params["w4"], Hp, Dp).astype(compute_dtype)
    b4 = _pad2(params["b4"], 1, Dp).astype(compute_dtype)

    grid = (Bp // block_b,)

    def row_spec(cols):
        return pl.BlockSpec((block_b, cols), lambda i: (i, 0))

    def full_spec(shape):
        return pl.BlockSpec(shape, lambda i: (0,) * len(shape))

    itemsize = jnp.dtype(compute_dtype).itemsize
    operands = (xp, w1, b1, w2, b2, w3, b3, w4, b4)
    bytes_accessed = sum(int(a.size) * itemsize for a in operands) \
        + (Bp * Qp + Bp * Dp) * 4
    cost = pl.CostEstimate(
        flops=2 * Bp * (Dp * Hp + Hp * Qp + Qp * Hp + Hp * Dp),
        transcendentals=0,
        bytes_accessed=bytes_accessed,
    )

    enc_pad, dec_pad = pl.pallas_call(
        ae_kernel,
        out_shape=(
            jax.ShapeDtypeStruct((Bp, Qp), jnp.float32),
            jax.ShapeDtypeStruct((Bp, Dp), jnp.float32),
        ),
        grid_spec=pltpu.PrefetchScalarGridSpec(
            num_scalar_prefetch=0,
            grid=grid,
            in_specs=[
                row_spec(Dp),
                full_spec(w1.shape), full_spec(b1.shape),
                full_spec(w2.shape), full_spec(b2.shape),
                full_spec(w3.shape), full_spec(b3.shape),
                full_spec(w4.shape), full_spec(b4.shape),
            ],
            out_specs=[row_spec(Qp), row_spec(Dp)],
        ),
        compiler_params=pltpu.CompilerParams(
            dimension_semantics=("parallel",)),
        cost_estimate=cost,
    )(*operands)

    return enc_pad[:B, :Q], dec_pad[:B, :D]


def init_ae_params(key, input_dim):
    """Deterministic init matching nn.Linear's U(-1/sqrt(fan_in), 1/sqrt(fan_in)).
    Weights stored pre-transposed as (in, out); biases as (1, out)."""
    nearest_power_of_2 = 2 ** round(math.log2(input_dim))
    half = nearest_power_of_2 // 2
    quarter = nearest_power_of_2 // 4

    def linear(key, fan_in, fan_out):
        kw, kb = jax.random.split(key)
        bound = 1.0 / math.sqrt(fan_in)
        w = jax.random.uniform(kw, (fan_in, fan_out), jnp.float32, -bound, bound)
        b = jax.random.uniform(kb, (1, fan_out), jnp.float32, -bound, bound)
        return w, b

    k1, k2, k3, k4 = jax.random.split(key, 4)
    w1, b1 = linear(k1, input_dim, half)
    w2, b2 = linear(k2, half, quarter)
    w3, b3 = linear(k3, quarter, half)
    w4, b4 = linear(k4, half, input_dim)
    return dict(w1=w1, b1=b1, w2=w2, b2=b2, w3=w3, b3=b3, w4=w4, b4=b4)


def ae_reference(x, p):
    h1 = jnp.maximum(x @ p["w1"] + p["b1"], 0.0)
    enc = h1 @ p["w2"] + p["b2"]
    h2 = jnp.maximum(enc, 0.0)
    h3 = jnp.maximum(h2 @ p["w3"] + p["b3"], 0.0)
    dec = h3 @ p["w4"] + p["b4"]
    return enc, dec


if __name__ == "__main__":
    input_dim = 64          # -> hidden sizes 32 and 16
    batch = 16

    key = jax.random.PRNGKey(0)
    kx, kp = jax.random.split(key)
    x = jax.random.normal(kx, (batch, input_dim), jnp.float32)
    params = init_ae_params(kp, input_dim)

    enc, dec = ae_forward(x, params)   # f32 operands (exact vs. reference)
    jax.block_until_ready((enc, dec))

    enc_ref, dec_ref = ae_reference(x, params)
    assert enc.shape == (batch, input_dim // 4)
    assert dec.shape == (batch, input_dim)
    assert jnp.allclose(enc, enc_ref, atol=1e-5, rtol=1e-5)
    assert jnp.allclose(dec, dec_ref, atol=1e-5, rtol=1e-5)

    print("KERNEL_OK")
</pallas_src>

<mosaic_0001>
module attributes {stable_mosaic.version = 11 : i64} {
  func.func @ae_kernel(%arg0: i32, %arg1: memref<16x128xf32, #tpu.memory_space<vmem>>, %arg2: memref<128x128xf32, #tpu.memory_space<vmem>>, %arg3: memref<1x128xf32, #tpu.memory_space<vmem>>, %arg4: memref<128x128xf32, #tpu.memory_space<vmem>>, %arg5: memref<1x128xf32, #tpu.memory_space<vmem>>, %arg6: memref<128x128xf32, #tpu.memory_space<vmem>>, %arg7: memref<1x128xf32, #tpu.memory_space<vmem>>, %arg8: memref<128x128xf32, #tpu.memory_space<vmem>>, %arg9: memref<1x128xf32, #tpu.memory_space<vmem>>, %arg10: memref<16x128xf32, #tpu.memory_space<vmem>>, %arg11: memref<16x128xf32, #tpu.memory_space<vmem>>) attributes {dimension_semantics = [#tpu.dimension_semantics<parallel>], iteration_bounds = array<i64: 1>, scalar_prefetch = 0 : i64, scratch_operands = 0 : i64, tpu.core_type = #tpu.core_type<tc>, window_params = [{transform_indices = @transform_0, window_bounds = array<i64: 16, 128>}, {pipeline_mode = #tpu.pipeline_mode<synchronous>, transform_indices = @transform_1, window_bounds = array<i64: 128, 128>}, {pipeline_mode = #tpu.pipeline_mode<synchronous>, transform_indices = @transform_2, window_bounds = array<i64: 1, 128>}, {pipeline_mode = #tpu.pipeline_mode<synchronous>, transform_indices = @transform_3, window_bounds = array<i64: 128, 128>}, {pipeline_mode = #tpu.pipeline_mode<synchronous>, transform_indices = @transform_4, window_bounds = array<i64: 1, 128>}, {pipeline_mode = #tpu.pipeline_mode<synchronous>, transform_indices = @transform_5, window_bounds = array<i64: 128, 128>}, {pipeline_mode = #tpu.pipeline_mode<synchronous>, transform_indices = @transform_6, window_bounds = array<i64: 1, 128>}, {pipeline_mode = #tpu.pipeline_mode<synchronous>, transform_indices = @transform_7, window_bounds = array<i64: 128, 128>}, {pipeline_mode = #tpu.pipeline_mode<synchronous>, transform_indices = @transform_8, window_bounds = array<i64: 1, 128>}, {transform_indices = @transform_9, window_bounds = array<i64: 16, 128>}, {transform_indices = @transform_10, window_bounds = array<i64: 16, 128>}]} {
    %c0 = arith.constant 0 : index
    %c0_0 = arith.constant 0 : index
    %0 = vector.load %arg1[%c0, %c0_0] : memref<16x128xf32, #tpu.memory_space<vmem>>, vector<16x128xf32>
    %c0_1 = arith.constant 0 : index
    %c0_2 = arith.constant 0 : index
    %1 = vector.load %arg2[%c0_1, %c0_2] : memref<128x128xf32, #tpu.memory_space<vmem>>, vector<128x128xf32>
    %cst = arith.constant dense<0.000000e+00> : vector<16x128xf32>
    %2 = tpu.matmul %0, %1, %cst {dimension_numbers = #tpu.dot_dimension_numbers<[1], [0], [0], [1], [0, 0, 1, 1], [], []>} : vector<16x128xf32>, vector<128x128xf32>, vector<16x128xf32> -> vector<16x128xf32>
    %c0_3 = arith.constant 0 : index
    %c0_4 = arith.constant 0 : index
    %3 = vector.load %arg3[%c0_3, %c0_4] : memref<1x128xf32, #tpu.memory_space<vmem>>, vector<1x128xf32>
    %4 = vector.broadcast %3 : vector<1x128xf32> to vector<16x128xf32>
    %5 = arith.addf %2, %4 : vector<16x128xf32>
    %cst_5 = arith.constant 0.000000e+00 : f32
    %6 = vector.broadcast %cst_5 : f32 to vector<16x128xf32>
    %7 = arith.maximumf %5, %6 : vector<16x128xf32>
    %c0_6 = arith.constant 0 : index
    %c0_7 = arith.constant 0 : index
    %8 = vector.load %arg4[%c0_6, %c0_7] : memref<128x128xf32, #tpu.memory_space<vmem>>, vector<128x128xf32>
    %cst_8 = arith.constant dense<0.000000e+00> : vector<16x128xf32>
    %9 = tpu.matmul %7, %8, %cst_8 {dimension_numbers = #tpu.dot_dimension_numbers<[1], [0], [0], [1], [0, 0, 1, 1], [], []>} : vector<16x128xf32>, vector<128x128xf32>, vector<16x128xf32> -> vector<16x128xf32>
    %c0_9 = arith.constant 0 : index
    %c0_10 = arith.constant 0 : index
    %10 = vector.load %arg5[%c0_9, %c0_10] : memref<1x128xf32, #tpu.memory_space<vmem>>, vector<1x128xf32>
    %11 = vector.broadcast %10 : vector<1x128xf32> to vector<16x128xf32>
    %12 = arith.addf %9, %11 : vector<16x128xf32>
    %c0_11 = arith.constant 0 : index
    %c0_12 = arith.constant 0 : index
    %13 = vector.load %arg10[%c0_11, %c0_12] : memref<16x128xf32, #tpu.memory_space<vmem>>, vector<16x128xf32>
    tpu.vector_store %arg10[%c0_11, %c0_12], %12 {strides = array<i32>} : memref<16x128xf32, #tpu.memory_space<vmem>>, vector<16x128xf32>,
    %cst_13 = arith.constant 0.000000e+00 : f32
    %14 = vector.broadcast %cst_13 : f32 to vector<16x128xf32>
    %15 = arith.maximumf %12, %14 : vector<16x128xf32>
    %c0_14 = arith.constant 0 : index
    %c0_15 = arith.constant 0 : index
    %16 = vector.load %arg6[%c0_14, %c0_15] : memref<128x128xf32, #tpu.memory_space<vmem>>, vector<128x128xf32>
    %cst_16 = arith.constant dense<0.000000e+00> : vector<16x128xf32>
    %17 = tpu.matmul %15, %16, %cst_16 {dimension_numbers = #tpu.dot_dimension_numbers<[1], [0], [0], [1], [0, 0, 1, 1], [], []>} : vector<16x128xf32>, vector<128x128xf32>, vector<16x128xf32> -> vector<16x128xf32>
    %c0_17 = arith.constant 0 : index
    %c0_18 = arith.constant 0 : index
    %18 = vector.load %arg7[%c0_17, %c0_18] : memref<1x128xf32, #tpu.memory_space<vmem>>, vector<1x128xf32>
    %19 = vector.broadcast %18 : vector<1x128xf32> to vector<16x128xf32>
    %20 = arith.addf %17, %19 : vector<16x128xf32>
    %cst_19 = arith.constant 0.000000e+00 : f32
    %21 = vector.broadcast %cst_19 : f32 to vector<16x128xf32>
    %22 = arith.maximumf %20, %21 : vector<16x128xf32>
    %c0_20 = arith.constant 0 : index
    %c0_21 = arith.constant 0 : index
    %23 = vector.load %arg8[%c0_20, %c0_21] : memref<128x128xf32, #tpu.memory_space<vmem>>, vector<128x128xf32>
    %cst_22 = arith.constant dense<0.000000e+00> : vector<16x128xf32>
    %24 = tpu.matmul %22, %23, %cst_22 {dimension_numbers = #tpu.dot_dimension_numbers<[1], [0], [0], [1], [0, 0, 1, 1], [], []>} : vector<16x128xf32>, vector<128x128xf32>, vector<16x128xf32> -> vector<16x128xf32>
    %c0_23 = arith.constant 0 : index
    %c0_24 = arith.constant 0 : index
    %25 = vector.load %arg9[%c0_23, %c0_24] : memref<1x128xf32, #tpu.memory_space<vmem>>, vector<1x128xf32>
    %26 = vector.broadcast %25 : vector<1x128xf32> to vector<16x128xf32>
    %27 = arith.addf %24, %26 : vector<16x128xf32>
    %c0_25 = arith.constant 0 : index
    %c0_26 = arith.constant 0 : index
    %28 = vector.load %arg11[%c0_25, %c0_26] : memref<16x128xf32, #tpu.memory_space<vmem>>, vector<16x128xf32>
    tpu.vector_store %arg11[%c0_25, %c0_26], %27 {strides = array<i32>} : memref<16x128xf32, #tpu.memory_space<vmem>>, vector<16x128xf32>,
    return
  }
  func.func @transform_0(%arg0: i32) -> (i32, i32) {
    %c0_i32 = arith.constant 0 : i32
    %c0_i32_0 = arith.constant 0 : i32
    return %arg0, %c0_i32 : i32, i32
  }
  func.func @transform_1(%arg0: i32) -> (i32, i32) {
    %c0_i32 = arith.constant 0 : i32
    %c0_i32_0 = arith.constant 0 : i32
    %c0_i32_1 = arith.constant 0 : i32
    return %c0_i32, %c0_i32_0 : i32, i32
  }
  func.func @transform_2(%arg0: i32) -> (i32, i32) {
    %c0_i32 = arith.constant 0 : i32
    %c0_i32_0 = arith.constant 0 : i32
    %c0_i32_1 = arith.constant 0 : i32
    return %c0_i32, %c0_i32_0 : i32, i32
  }
  func.func @transform_3(%arg0: i32) -> (i32, i32) {
    %c0_i32 = arith.constant 0 : i32
    %c0_i32_0 = arith.constant 0 : i32
    %c0_i32_1 = arith.constant 0 : i32
    return %c0_i32, %c0_i32_0 : i32, i32
  }
  func.func @transform_4(%arg0: i32) -> (i32, i32) {
    %c0_i32 = arith.constant 0 : i32
    %c0_i32_0 = arith.constant 0 : i32
    %c0_i32_1 = arith.constant 0 : i32
    return %c0_i32, %c0_i32_0 : i32, i32
  }
  func.func @transform_5(%arg0: i32) -> (i32, i32) {
    %c0_i32 = arith.constant 0 : i32
    %c0_i32_0 = arith.constant 0 : i32
    %c0_i32_1 = arith.constant 0 : i32
    return %c0_i32, %c0_i32_0 : i32, i32
  }
  func.func @transform_6(%arg0: i32) -> (i32, i32) {
    %c0_i32 = arith.constant 0 : i32
    %c0_i32_0 = arith.constant 0 : i32
    %c0_i32_1 = arith.constant 0 : i32
    return %c0_i32, %c0_i32_0 : i32, i32
  }
  func.func @transform_7(%arg0: i32) -> (i32, i32) {
    %c0_i32 = arith.constant 0 : i32
    %c0_i32_0 = arith.constant 0 : i32
    %c0_i32_1 = arith.constant 0 : i32
    return %c0_i32, %c0_i32_0 : i32, i32
  }
  func.func @transform_8(%arg0: i32) -> (i32, i32) {
    %c0_i32 = arith.constant 0 : i32
    %c0_i32_0 = arith.constant 0 : i32
    %c0_i32_1 = arith.constant 0 : i32
    return %c0_i32, %c0_i32_0 : i32, i32
  }
  func.func @transform_9(%arg0: i32) -> (i32, i32) {
    %c0_i32 = arith.constant 0 : i32
    %c0_i32_0 = arith.constant 0 : i32
    return %arg0, %c0_i32 : i32, i32
  }
  func.func @transform_10(%arg0: i32) -> (i32, i32) {
    %c0_i32 = arith.constant 0 : i32
    %c0_i32_0 = arith.constant 0 : i32
    return %arg0, %c0_i32 : i32, i32
  }
}

</mosaic_0001>

<bundles_post_ra>
// kernel: tpu_custom_call.1
= control target key start
LH: loop header
LB: loop body
LE: loop exit
PB: predicated region body
PF: predicated region fallthrough
CT: control target
= control target key end

     0   :  { %16 = vsyncpa [#allocation3], 0  ;;  %s1255_s0 = inlined_call_operand.hbm [shape: f32[16,128], index: 0, kind: input, shape index: {}]   ;;  %s1256_s1 = inlined_call_operand.hbm [shape: f32[128,128], index: 1, kind: input, shape index: {}]   ;;  %s1257_s2 = inlined_call_operand.vmem [shape: f32[1,128], index: 2, kind: input, shape index: {}]   ;;  %s1258_s3 = inlined_call_operand.hbm [shape: f32[128,128], index: 3, kind: input, shape index: {}]   ;;  %s1259_s4 = inlined_call_operand.vmem [shape: f32[1,128], index: 4, kind: input, shape index: {}]   ;;  %s1260_s5 = inlined_call_operand.hbm [shape: f32[128,128], index: 5, kind: input, shape index: {}]   ;;  %s1261_s6 = inlined_call_operand.vmem [shape: f32[1,128], index: 6, kind: input, shape index: {}]   ;;  %s1262_s7 = inlined_call_operand.hbm [shape: f32[128,128], index: 7, kind: input, shape index: {}]   ;;  %s1263_s8 = inlined_call_operand.vmem [shape: f32[1,128], index: 8, kind: input, shape index: {}]   ;;  %s1264_s9 = inlined_call_operand.hbm [shape: f32[16,128], index: 9, kind: output, shape index: {0}]   ;;  %s1265_s10 = inlined_call_operand.hbm [shape: f32[16,128], index: 10, kind: output, shape index: {1}]  }
   0x1   :  { %17 = vsyncpa [#allocation6], 0 }
   0x2   :  { %18 = vsyncpa [#allocation9], 0 }
   0x3   :  { %19 = vsyncpa [#allocation4], 0 }
   0x4   :  { %20 = vsyncpa [#allocation13], 0  ;;  %s1060_s13 = smov [#allocation5]   ;;  %s1061_s15 = smov [#allocation8]  }
   0x5   :  { %s38_s14 = sshll.u32 %s1060_s13, 4  ;;  %s66_s16 = sshll.u32 %s1061_s15, 4  ;;  %s39_s14 = int_to_ptr.vmem [resolvable:$true] %s38_s14  ;;  %s1124_s16 = int_to_ptr.vmem [resolvable:$true] %s66_s16 }
   0x6   :  { %s896_s19 = scalar_lea.hbm %s1256_s1, 2048 }
   0x7   :  { %p897_p0 = scmp.ne.s32.totalorder %s1256_s1, %s896_s19  ;;  %p900_p1 = scmp.lt.u32.totalorder %s896_s19, %s1256_s1 }
   0x9   :  { %p902_p2 = pnand %p900_p1, %p897_p0 }
   0xb   :  { %905 = shalt.err (!%p902_p2)
}
   0xc   :  { %s906_s24 = scalar_lea.vmem %s39_s14, 2048  ;;  %p911_p4 = scmp.lt.s32.totalorder %s39_s14, %s39_s14 }
   0xd   :  { %p907_p3 = scmp.ne.s32.totalorder %s39_s14, %s906_s24  ;;  %p912_p5 = scmp.lt.s32.totalorder %s906_s24, %s906_s24 }
   0xf   :  { %p913_p6 = por %p912_p5, %p911_p4 }
  0x11   :  { %p914_p7 = pnand %p913_p6, %p907_p3 }
  0x13   :  { %917 = shalt.err (!%p914_p7)
}
  0x14   :  { %s1062_s25 = smov 128   ;;  %s1063_s26 = smov 8  }
  0x15   :  { %44 = dma.hbm_to_vmem [thread:$0]  %s1256_s1, 2048, %s39_s14, [#allocation6], %s1062_s25, %s1062_s25, %s1063_s26  }
  0x16   :  { %s918_s11 = scalar_lea.hbm %s1260_s5, 2048 }
  0x17   :  { %p919_p8 = scmp.ne.s32.totalorder %s1260_s5, %s918_s11  ;;  %p922_p9 = scmp.lt.u32.totalorder %s918_s11, %s1260_s5 }
  0x19   :  { %p924_p10 = pnand %p922_p9, %p919_p8 }
  0x1b   :  { %927 = shalt.err (!%p924_p10)
}
  0x1c   :  { %s928_s18 = scalar_lea.vmem %s1124_s16, 2048  ;;  %p933_p12 = scmp.lt.s32.totalorder %s1124_s16, %s1124_s16 }
  0x1d   :  { %p929_p11 = scmp.ne.s32.totalorder %s1124_s16, %s928_s18  ;;  %p934_p13 = scmp.lt.s32.totalorder %s928_s18, %s928_s18 }
  0x1f   :  { %p935_p0 = por %p934_p13, %p933_p12 }
  0x21   :  { %p936_p1 = pnand %p935_p0, %p929_p11 }
  0x23   :  { %939 = shalt.err (!%p936_p1)
}
  0x24   :  { %72 = dma.hbm_to_vmem [thread:$0]  %s1260_s5, 2048, %s1124_s16, [#allocation9], %s1062_s25, %s1062_s25, %s1063_s26  }
  0x25   :  { %s1064_s19 = smov [#allocation2]   ;;  %s1065_s21 = smov [#allocation7]  }
  0x26   :  { %s26_s20 = sshll.u32 %s1064_s19, 4  ;;  %s52_s22 = sshll.u32 %s1065_s21, 4  ;;  %s27_s20 = int_to_ptr.vmem [resolvable:$true] %s26_s20  ;;  %s1161_s22 = int_to_ptr.vmem [resolvable:$true] %s52_s22 }
  0x27   :  { %s940_s27 = scalar_lea.hbm %s1255_s0, 256 }
  0x28   :  { %p941_p2 = scmp.ne.s32.totalorder %s1255_s0, %s940_s27  ;;  %p944_p3 = scmp.lt.u32.totalorder %s940_s27, %s1255_s0 }
  0x2a   :  { %p946_p4 = pnand %p944_p3, %p941_p2 }
  0x2c   :  { %949 = shalt.err (!%p946_p4)
}
  0x2d   :  { %s950_s5 = scalar_lea.vmem %s27_s20, 256  ;;  %p955_p6 = scmp.lt.s32.totalorder %s27_s20, %s27_s20 }
  0x2e   :  { %p951_p5 = scmp.ne.s32.totalorder %s27_s20, %s950_s5  ;;  %p956_p7 = scmp.lt.s32.totalorder %s950_s5, %s950_s5 }
  0x30   :  { %p957_p8 = por %p956_p7, %p955_p6 }
  0x32   :  { %p958_p9 = pnand %p957_p8, %p951_p5 }
  0x34   :  { %961 = shalt.err (!%p958_p9)
}
  0x35   :  { %32 = dma.hbm_to_vmem [thread:$0]  %s1255_s0, 256, %s27_s20, [#allocation3], %s1062_s25, %s1062_s25, %s1063_s26  }
  0x36   :  { %s962_s17 = scalar_lea.hbm %s1258_s3, 2048 }
  0x37   :  { %p963_p10 = scmp.ne.s32.totalorder %s1258_s3, %s962_s17  ;;  %p966_p11 = scmp.lt.u32.totalorder %s962_s17, %s1258_s3 }
  0x39   :  { %p968_p12 = pnand %p966_p11, %p963_p10 }
  0x3b   :  { %971 = shalt.err (!%p968_p12)
}
  0x3c   :  { %s972_s21 = scalar_lea.vmem %s1161_s22, 2048  ;;  %p977_p0 = scmp.lt.s32.totalorder %s1161_s22, %s1161_s22 }
  0x3d   :  { %p973_p13 = scmp.ne.s32.totalorder %s1161_s22, %s972_s21  ;;  %p978_p1 = scmp.lt.s32.totalorder %s972_s21, %s972_s21 }
  0x3f   :  { %p979_p2 = por %p978_p1, %p977_p0 }
  0x41   :  { %p980_p3 = pnand %p979_p2, %p973_p13 }
  0x43   :  { %983 = shalt.err (!%p980_p3)
}
  0x44   :  { %58 = dma.hbm_to_vmem [thread:$0]  %s1258_s3, 2048, %s1161_s22, [#allocation6], %s1062_s25, %s1062_s25, %s1063_s26  }
  0x45   :  { %s1066_s23 = smov [#allocation10]   ;;  %s984_s29 = scalar_lea.hbm %s1262_s7, 2048 }
  0x46   :  { %s80_s24 = sshll.u32 %s1066_s23, 4  ;;  %p985_p4 = scmp.ne.s32.totalorder %s1262_s7, %s984_s29  ;;  %s81_s24 = int_to_ptr.vmem [resolvable:$true] %s80_s24 }
  0x47   :  { %p988_p5 = scmp.lt.u32.totalorder %s984_s29, %s1262_s7 }
  0x49   :  { %p990_p6 = pnand %p988_p5, %p985_p4 }
  0x4b   :  { %993 = shalt.err (!%p990_p6)
}
  0x4c   :  { %s994_s12 = scalar_lea.vmem %s81_s24, 2048  ;;  %p999_p8 = scmp.lt.s32.totalorder %s81_s24, %s81_s24 }
  0x4d   :  { %p995_p7 = scmp.ne.s32.totalorder %s81_s24, %s994_s12  ;;  %p1000_p9 = scmp.lt.s32.totalorder %s994_s12, %s994_s12 }
  0x4f   :  { %p1001_p10 = por %p1000_p9, %p999_p8 }
  0x51   :  { %p1002_p11 = pnand %p1001_p10, %p995_p7 }
  0x53   :  { %1005 = shalt.err (!%p1002_p11)
}
  0x54   :  { %86 = dma.hbm_to_vmem [thread:$0]  %s1262_s7, 2048, %s81_s24, [#allocation9], %s1062_s25, %s1062_s25, %s1063_s26  }
  0x55   :  { %1050 = dma.done.wait [#allocation3], 256  }
  0x56   :  { %1051 = vsyncadd [#allocation3], 4294967040 }
  0x57   :  { %1052 = dma.done.wait [#allocation6], 4096  }
  0x58   :  { %1053 = vsyncadd [#allocation6], 4294963200 }
  0x59   :  { %1054 = dma.done.wait [#allocation9], 4096  }
  0x5a   :  { %1055 = vsyncadd [#allocation9], 4294963200  ;;  %v106_v0 = vld [vmem:[#allocation5] sm:$0xff]  ;;  %v107_v1 = vld [vmem:[#allocation5 + $0x8] sm:$0xff] }
  0x5b   :  { %v108_v2 = vld [vmem:[#allocation5 + $0x10] sm:$0xff]  ;;  %v759_v3 = vpack.c.bf16 %v107_v1, %v106_v0  ;;  %v109_v4 = vld [vmem:[#allocation5 + $0x18] sm:$0xff]  ;;  %v110_v6 = vld [vmem:[#allocation5 + $0x20] sm:$0xff] }
  0x5c   :  { %v763_v5 = vpack.c.bf16 %v109_v4, %v108_v2  ;;  %v111_v7 = vld [vmem:[#allocation5 + $0x28] sm:$0xff]  ;;  %v112_v9 = vld [vmem:[#allocation5 + $0x30] sm:$0xff]  ;;  %v113_v10 = vld [vmem:[#allocation5 + $0x38] sm:$0xff] }
  0x5d   :  { %760 = vmatprep.subr.bf16.mxu0 %v759_v3  ;;  %v767_v8 = vpack.c.bf16 %v111_v7, %v110_v6  ;;  %v104_v11 = vld [vmem:[#allocation2] sm:$0xff]  ;;  %v206_v12 = vld [vmem:[#allocation7] sm:$0xff]  ;;  %v207_v13 = vld [vmem:[#allocation7 + $0x8] sm:$0xff]  ;;  %v771_v20 = vpack.c.bf16 %v113_v10, %v112_v9 }
  0x5e   :  { %762 = vmatpush3.bf16.msra.mxu0 %v759_v3  ;;  %651 = vmatprep.mubr.f32.mxu0 %v104_v11  ;;  %v208_v14 = vld [vmem:[#allocation7 + $0x10] sm:$0xff]  ;;  %v791_v15 = vpack.c.bf16 %v207_v13, %v206_v12  ;;  %v209_v16 = vld [vmem:[#allocation7 + $0x18] sm:$0xff]  ;;  %v210_v18 = vld [vmem:[#allocation7 + $0x20] sm:$0xff] }
  0x5f   :  { %764 = vmatprep.subr.bf16.mxu0 %v763_v5  ;;  %v795_v17 = vpack.c.bf16 %v209_v16, %v208_v14  ;;  %v211_v19 = vld [vmem:[#allocation7 + $0x28] sm:$0xff]  ;;  %v114_v21 = vld [vmem:[#allocation5 + $0x40] sm:$0xff]  ;;  %v212_v24 = vld [vmem:[#allocation7 + $0x30] sm:$0xff] }
  0x60   :  { %792 = vmatprep.subr.bf16.mxu1 %v791_v15  ;;  %v115_v22 = vld [vmem:[#allocation5 + $0x48] sm:$0xff]  ;;  %v799_v23 = vpack.c.bf16 %v211_v19, %v210_v18  ;;  %v213_v25 = vld [vmem:[#allocation7 + $0x38] sm:$0xff]  ;;  %v116_v27 = vld [vmem:[#allocation5 + $0x50] sm:$0xff] }
  0x61   :  { %794 = vmatpush3.bf16.msra.mxu1 %v791_v15  ;;  %v775_v26 = vpack.c.bf16 %v115_v22, %v114_v21  ;;  %v117_v28 = vld [vmem:[#allocation5 + $0x58] sm:$0xff]  ;;  %v803_v29 = vpack.c.bf16 %v213_v25, %v212_v24  ;;  %v214_v30 = vld [vmem:[#allocation7 + $0x40] sm:$0xff]  ;;  %v215_v31 = vld [vmem:[#allocation7 + $0x48] sm:$0xff] }
  0x62   :  { %766 = vmatpush3.bf16.msra.mxu0 %v763_v5  ;;  %796 = vmatprep.subr.bf16.mxu1 %v795_v17  ;;  %v779_v32 = vpack.c.bf16 %v117_v28, %v116_v27  ;;  %v118_v33 = vld [vmem:[#allocation5 + $0x60] sm:$0xff]  ;;  %v119_v34 = vld [vmem:[#allocation5 + $0x68] sm:$0xff]  ;;  %v807_v35 = vpack.c.bf16 %v215_v31, %v214_v30  ;;  %v216_v36 = vld [vmem:[#allocation7 + $0x50] sm:$0xff] }
  0x63   :  { %768 = vmatprep.subr.bf16.mxu0 %v767_v8  ;;  %v217_v37 = vld [vmem:[#allocation7 + $0x58] sm:$0xff]  ;;  %v783_v38 = vpack.c.bf16 %v119_v34, %v118_v33  ;;  %v120_v39 = vld [vmem:[#allocation5 + $0x70] sm:$0xff]  ;;  %v218_v42 = vld [vmem:[#allocation7 + $0x60] sm:$0xff] }
  0x64   :  { %v121_v40 = vld [vmem:[#allocation5 + $0x78] sm:$0xff]  ;;  %v811_v41 = vpack.c.bf16 %v217_v37, %v216_v36  ;;  %v219_v43 = vld [vmem:[#allocation7 + $0x68] sm:$0xff]  ;;  %v220_v47 = vld [vmem:[#allocation7 + $0x70] sm:$0xff] }
  0x65   :  { %798 = vmatpush3.bf16.msra.mxu1 %v795_v17  ;;  %v787_v44 = vpack.c.bf16 %v121_v40, %v120_v39  ;;  %v815_v45 = vpack.c.bf16 %v219_v43, %v218_v42  ;;  %v105_v46 = vld [vmem:[#allocation2 + $0x8] sm:$0xff]  ;;  %v308_v50 = vld [vmem:[#allocation8] sm:$0xff]  ;;  %v309_v51 = vld [vmem:[#allocation8 + $0x8] sm:$0xff] }
  0x66   :  { %770 = vmatpush3.bf16.msra.mxu0 %v767_v8  ;;  %800 = vmatprep.subr.bf16.mxu1 %v799_v23  ;;  %v221_v48 = vld [vmem:[#allocation7 + $0x78] sm:$0xff]  ;;  %v310_v52 = vld [vmem:[#allocation8 + $0x10] sm:$0xff]  ;;  %v823_v53 = vpack.c.bf16 %v309_v51, %v308_v50  ;;  %v312_v56 = vld [vmem:[#allocation8 + $0x20] sm:$0xff] }
  0x67   :  { %772 = vmatprep.subr.bf16.mxu0 %v771_v20  ;;  %v819_v49 = vpack.c.bf16 %v221_v48, %v220_v47  ;;  %v311_v54 = vld [vmem:[#allocation8 + $0x18] sm:$0xff]  ;;  %v313_v57 = vld [vmem:[#allocation8 + $0x28] sm:$0xff]  ;;  %v314_v59 = vld [vmem:[#allocation8 + $0x30] sm:$0xff] }
  0x68   :  { %v827_v55 = vpack.c.bf16 %v311_v54, %v310_v52  ;;  %v831_v58 = vpack.c.bf16 %v313_v57, %v312_v56  ;;  %v315_v60 = vld [vmem:[#allocation8 + $0x38] sm:$0xff]  ;;  %v316_v62 = vld [vmem:[#allocation8 + $0x40] sm:$0xff]  ;;  %v317_v63 = vld [vmem:[#allocation8 + $0x48] sm:$0xff] }
  0x69   :  { %802 = vmatpush3.bf16.msra.mxu1 %v799_v23  ;;  %v835_v61 = vpack.c.bf16 %v315_v60, %v314_v59  ;;  %v839_v0 = vpack.c.bf16 %v317_v63, %v316_v62  ;;  %v318_v1 = vld [vmem:[#allocation8 + $0x50] sm:$0xff]  ;;  %v319_v2 = vld [vmem:[#allocation8 + $0x58] sm:$0xff]  ;;  %v320_v4 = vld [vmem:[#allocation8 + $0x60] sm:$0xff] }
  0x6a   :  { %774 = vmatpush3.bf16.msra.mxu0 %v771_v20  ;;  %804 = vmatprep.subr.bf16.mxu1 %v803_v29  ;;  %v843_v3 = vpack.c.bf16 %v319_v2, %v318_v1  ;;  %v321_v5 = vld [vmem:[#allocation8 + $0x68] sm:$0xff]  ;;  %v543_v7 = vld [vmem:[%s1257_s2] ss:$0 sm:$0xff]  ;;  %v323_v15 = vld [vmem:[#allocation8 + $0x78] sm:$0xff] }
  0x6b   :  { %776 = vmatprep.subr.bf16.mxu0 %v775_v26  ;;  %v847_v6 = vpack.c.bf16 %v321_v5, %v320_v4  ;;  %v322_v14 = vld [vmem:[#allocation8 + $0x70] sm:$0xff]  ;;  %v408_v17 = vld [vmem:[#allocation10] sm:$0xff]  ;;  %v409_v18 = vld [vmem:[#allocation10 + $0x8] sm:$0xff] }
  0x6c   :  { %v851_v16 = vpack.c.bf16 %v323_v15, %v322_v14  ;;  %v410_v19 = vld [vmem:[#allocation10 + $0x10] sm:$0xff]  ;;  %v855_v20 = vpack.c.bf16 %v409_v18, %v408_v17  ;;  %v411_v21 = vld [vmem:[#allocation10 + $0x18] sm:$0xff]  ;;  %v412_v23 = vld [vmem:[#allocation10 + $0x20] sm:$0xff] }
  0x6d   :  { %806 = vmatpush3.bf16.msra.mxu1 %v803_v29  ;;  %v859_v22 = vpack.c.bf16 %v411_v21, %v410_v19  ;;  %v413_v24 = vld [vmem:[#allocation10 + $0x28] sm:$0xff]  ;;  %v415_v27 = vld [vmem:[#allocation10 + $0x38] sm:$0xff]  ;;  %v416_v29 = vld [vmem:[#allocation10 + $0x40] sm:$0xff] }
  0x6e   :  { %778 = vmatpush3.bf16.msra.mxu0 %v775_v26  ;;  %808 = vmatprep.subr.bf16.mxu1 %v807_v35  ;;  %v863_v25 = vpack.c.bf16 %v413_v24, %v412_v23  ;;  %v414_v26 = vld [vmem:[#allocation10 + $0x30] sm:$0xff]  ;;  %v417_v30 = vld [vmem:[#allocation10 + $0x48] sm:$0xff]  ;;  %v419_v33 = vld [vmem:[#allocation10 + $0x58] sm:$0xff] }
  0x6f   :  { %780 = vmatprep.subr.bf16.mxu0 %v779_v32  ;;  %v867_v28 = vpack.c.bf16 %v415_v27, %v414_v26  ;;  %v871_v31 = vpack.c.bf16 %v417_v30, %v416_v29  ;;  %v421_v36 = vld [vmem:[#allocation10 + $0x68] sm:$0xff]  ;;  %v545_v48 = vld [vmem:[%s1261_s6] ss:$0 sm:$0xff] }
  0x71   :  { %810 = vmatpush3.bf16.msra.mxu1 %v807_v35  ;;  %v420_v35 = vld [vmem:[#allocation10 + $0x60] sm:$0xff] }
  0x72   :  { %782 = vmatpush3.bf16.msra.mxu0 %v779_v32  ;;  %812 = vmatprep.subr.bf16.mxu1 %v811_v41  ;;  %v418_v32 = vld [vmem:[#allocation10 + $0x50] sm:$0xff]  ;;  %v879_v37 = vpack.c.bf16 %v421_v36, %v420_v35 }
  0x73   :  { %784 = vmatprep.subr.bf16.mxu0 %v783_v38  ;;  %v875_v34 = vpack.c.bf16 %v419_v33, %v418_v32 }
  0x75   :  { %814 = vmatpush3.bf16.msra.mxu1 %v811_v41 }
  0x76   :  { %786 = vmatpush3.bf16.msra.mxu0 %v783_v38  ;;  %816 = vmatprep.subr.bf16.mxu1 %v815_v45  ;;  %v544_v38 = vld [vmem:[%s1259_s4] ss:$0 sm:$0xff]  ;;  %s1067_s4 = smov [#allocation11]  }
  0x77   :  { %788 = vmatprep.subr.bf16.mxu0 %v787_v44  ;;  %s513_s1 = sshll.u32 %s1067_s4, 4  ;;  %s514_s1 = int_to_ptr.vmem [resolvable:$true] %s513_s1 }
  0x78   :  { %s1006_s14 = scalar_lea.vmem %s514_s1, 256  ;;  %p1011_p13 = scmp.lt.s32.totalorder %s514_s1, %s514_s1 }
  0x79   :  { %818 = vmatpush3.bf16.msra.mxu1 %v815_v45  ;;  %v422_v45 = vld [vmem:[#allocation10 + $0x70] sm:$0xff]  ;;  %p1007_p12 = scmp.ne.s32.totalorder %s514_s1, %s1006_s14  ;;  %p1012_p0 = scmp.lt.s32.totalorder %s1006_s14, %s1006_s14 }
  0x7a   :  { %790 = vmatpush3.bf16.msra.mxu0 %v787_v44  ;;  %820 = vmatprep.subr.bf16.mxu1 %v819_v49 }
  0x7b   :  { %824 = vmatprep.subr.bf16.mxu0 %v823_v53  ;;  %p1013_p1 = por %p1012_p0, %p1011_p13 }
  0x7d   :  { %652 = vmatmul.mubr.f32.vlgmr.msra.gmra.mrb[0].mxu0 %v105_v46  ;;  %822 = vmatpush3.bf16.msra.mxu1 %v819_v49  ;;  %v423_v46 = vld [vmem:[#allocation10 + $0x78] sm:$0xff]  ;;  %p1014_p2 = pnand %p1013_p1, %p1007_p12 }
  0x7e   :  { %826 = vmatpush3.bf16.msra.mxu0 %v823_v53  ;;  %856 = vmatprep.subr.bf16.mxu1 %v855_v20  ;;  %v883_v47 = vpack.c.bf16 %v423_v46, %v422_v45 }
  0x7f   :  { %828 = vmatprep.subr.bf16.mxu0 %v827_v55 }
  0x82   :  { %830 = vmatpush3.bf16.msra.mxu0 %v827_v55 }
  0x83   :  { %832 = vmatprep.subr.bf16.mxu0 %v831_v58 }
  0x86   :  { %834 = vmatpush3.bf16.msra.mxu0 %v831_v58 }
  0x87   :  { %836 = vmatprep.subr.bf16.mxu0 %v835_v61 }
  0x8a   :  { %838 = vmatpush3.bf16.msra.mxu0 %v835_v61 }
  0x8b   :  { %840 = vmatprep.subr.bf16.mxu0 %v839_v0 }
  0x8e   :  { %842 = vmatpush3.bf16.msra.mxu0 %v839_v0 }
  0x8f   :  { %844 = vmatprep.subr.bf16.mxu0 %v843_v3 }
  0x92   :  { %846 = vmatpush3.bf16.msra.mxu0 %v843_v3 }
  0x93   :  { %848 = vmatprep.subr.bf16.mxu0 %v847_v6 }
  0x96   :  { %850 = vmatpush3.bf16.msra.mxu0 %v847_v6 }
  0x97   :  { %852 = vmatprep.subr.bf16.mxu0 %v851_v16 }
  0x9a   :  { %854 = vmatpush3.bf16.msra.mxu0 %v851_v16 }
 0x150   :  { %v653_v8 = vpop.f32.mrb[0].mxu0 }
 0x151   :  { %v201_v9 = vadd.f32 %v653_v8, %v543_v7  ;;  %v195_v10 = vpop.f32.mrb[1].mxu0 }
 0x152   :  { %v196_v11 = vadd.f32 %v543_v7, %v195_v10 }
 0x153   :  { %v205_v13 = vmax.f32 %v201_v9, 0.0 }
 0x154   :  { %v204_v12 = vmax.f32 %v196_v11, 0.0 }
 0x156   :  { %686 = vmatprep.mubr.f32.mxu1 %v204_v12 }
 0x157   :  { %687 = vmatmul.mubr.f32.vlgmr.msra.gmra.mrb[0].mxu1 %v205_v13 }
 0x158   :  { %858 = vmatpush3.bf16.msra.mxu1 %v855_v20 }
 0x159   :  { %860 = vmatprep.subr.bf16.mxu1 %v859_v22 }
 0x15c   :  { %862 = vmatpush3.bf16.msra.mxu1 %v859_v22 }
 0x15d   :  { %864 = vmatprep.subr.bf16.mxu1 %v863_v25 }
 0x160   :  { %866 = vmatpush3.bf16.msra.mxu1 %v863_v25 }
 0x161   :  { %868 = vmatprep.subr.bf16.mxu1 %v867_v28 }
 0x164   :  { %870 = vmatpush3.bf16.msra.mxu1 %v867_v28 }
 0x165   :  { %872 = vmatprep.subr.bf16.mxu1 %v871_v31 }
 0x168   :  { %874 = vmatpush3.bf16.msra.mxu1 %v871_v31 }
 0x169   :  { %876 = vmatprep.subr.bf16.mxu1 %v875_v34 }
 0x16c   :  { %878 = vmatpush3.bf16.msra.mxu1 %v875_v34 }
 0x16d   :  { %880 = vmatprep.subr.bf16.mxu1 %v879_v37 }
 0x170   :  { %882 = vmatpush3.bf16.msra.mxu1 %v879_v37 }
 0x171   :  { %884 = vmatprep.subr.bf16.mxu1 %v883_v47 }
 0x174   :  { %886 = vmatpush3.bf16.msra.mxu1 %v883_v47 }
 0x22a   :  { %v688_v39 = vpop.f32.mrb[0].mxu1 }
 0x22b   :  { %v301_v40 = vadd.f32 %v688_v39, %v544_v38  ;;  %v295_v41 = vpop.f32.mrb[1].mxu1 }
 0x22c   :  { %v296_v42 = vadd.f32 %v544_v38, %v295_v41 }
 0x22d   :  { %305 = vst [vmem:[#allocation11 + $0x8] sm:$0xff] %v301_v40  ;;  %v307_v44 = vmax.f32 %v301_v40, 0.0 }
 0x22e   :  { %304 = vst [vmem:[#allocation11] sm:$0xff] %v296_v42  ;;  %v306_v43 = vmax.f32 %v296_v42, 0.0 }
 0x230   :  { %721 = vmatprep.mubr.f32.mxu0 %v306_v43 }
 0x231   :  { %722 = vmatmul.mubr.f32.vlgmr.msra.gmra.mrb[2].mxu0 %v307_v44 }
 0x304   :  { %v723_v49 = vpop.f32.mrb[2].mxu0 }
 0x305   :  { %v403_v50 = vadd.f32 %v723_v49, %v545_v48  ;;  %v397_v51 = vpop.f32.mrb[3].mxu0 }
 0x306   :  { %v398_v52 = vadd.f32 %v545_v48, %v397_v51 }
 0x307   :  { %v407_v54 = vmax.f32 %v403_v50, 0.0 }
 0x308   :  { %v406_v53 = vmax.f32 %v398_v52, 0.0 }
 0x30a   :  { %756 = vmatprep.mubr.f32.mxu1 %v406_v53 }
 0x30b   :  { %757 = vmatmul.mubr.f32.vlgmr.msra.gmra.mrb[2].mxu1 %v407_v54 }
 0x30c   :  { %1017 = shalt.err (!%p1014_p2)
}
 0x30d   :  { %s1018_s21 = scalar_lea.hbm %s1264_s9, 256 }
 0x30e   :  { %p1019_p3 = scmp.ne.s32.totalorder %s1264_s9, %s1018_s21  ;;  %p1022_p4 = scmp.lt.u32.totalorder %s1018_s21, %s1264_s9 }
 0x310   :  { %p1024_p5 = pnand %p1022_p4, %p1019_p3 }
 0x312   :  { %1027 = shalt.err (!%p1024_p5)
}
 0x313   :  { %519 = dma.vmem_to_hbm [thread:$0]  %s514_s1, 256, %s1264_s9, [#allocation4], %s1062_s25, %s1062_s25, %s1063_s26  }
 0x314   :  { %v546_v55 = vld [vmem:[%s1263_s8] ss:$0 sm:$0xff]  ;;  %s1068_s11 = smov [#allocation12]  }
 0x315   :  { %s525_s5 = sshll.u32 %s1068_s11, 4  ;;  %s526_s5 = int_to_ptr.vmem [resolvable:$true] %s525_s5 }
 0x316   :  { %s1028_s16 = scalar_lea.vmem %s526_s5, 256  ;;  %p1033_p7 = scmp.lt.s32.totalorder %s526_s5, %s526_s5 }
 0x317   :  { %p1029_p6 = scmp.ne.s32.totalorder %s526_s5, %s1028_s16  ;;  %p1034_p8 = scmp.lt.s32.totalorder %s1028_s16, %s1028_s16 }
 0x319   :  { %p1035_p9 = por %p1034_p8, %p1033_p7 }
 0x31b   :  { %p1036_p10 = pnand %p1035_p9, %p1029_p6 }
 0x3de   :  { %v758_v56 = vpop.f32.mrb[2].mxu1 }
 0x3df   :  { %v503_v57 = vadd.f32 %v758_v56, %v546_v55  ;;  %v497_v58 = vpop.f32.mrb[3].mxu1 }
 0x3e0   :  { %v498_v59 = vadd.f32 %v546_v55, %v497_v58 }
 0x3e1   :  { %507 = vst [vmem:[#allocation12 + $0x8] sm:$0xff] %v503_v57 }
 0x3e2   :  { %506 = vst [vmem:[#allocation12] sm:$0xff] %v498_v59 }
 0x3e3   :  { %1039 = shalt.err (!%p1036_p10)
}
 0x3e4   :  { %s1040_s8 = scalar_lea.hbm %s1265_s10, 256 }
 0x3e5   :  { %p1041_p11 = scmp.ne.s32.totalorder %s1265_s10, %s1040_s8  ;;  %p1044_p12 = scmp.lt.u32.totalorder %s1040_s8, %s1265_s10 }
 0x3e7   :  { %p1046_p13 = pnand %p1044_p12, %p1041_p11 }
 0x3e9   :  { %1049 = shalt.err (!%p1046_p13)
}
 0x3ea   :  { %531 = dma.vmem_to_hbm [thread:$0]  %s526_s5, 256, %s1265_s10, [#allocation13], %s1062_s25, %s1062_s25, %s1063_s26  }
 0x3eb   :  { %1056 = dma.done.wait [#allocation4], 256  }
 0x3ec   :  { %1057 = vsyncadd [#allocation4], 4294967040 }
 0x3ed   :  { %1058 = dma.done.wait [#allocation13], 256  }
 0x3ee   :  { %1059 = vsyncadd [#allocation13], 4294967040 }
 0x3ef   :  { %538 = vsyncpa [#allocation3], 1 }
 0x3f0   :  { %539 = vsyncpa [#allocation6], 1 }
 0x3f1   :  { %540 = vsyncpa [#allocation9], 1 }
 0x3f2   :  { %541 = vsyncpa [#allocation4], 1 }
 0x3f3   :  { %542 = vsyncpa [#allocation13], 1 }

</bundles_post_ra>
